<compile_context>
chip_gen: v7x
topology: tpu7x:2x2x1
jax: 0.10.0
libtpu: 0.0.40
codegen_flags: <defaults>
</compile_context>

<pallas_src>
import functools

import jax
import jax.numpy as jnp
from jax import lax
from jax.experimental import pallas as pl
from jax.experimental.pallas import tpu as pltpu


class Config:
    temp = 0.07
    alpha = 2.0


_NEG = -1e30  # finite "-inf" sentinel for the running row max (exp(_NEG - m) == 0, 0*_NEG finite)


def _hmlc_kernel(af_ref, cf_ref, al_ref, cl_ref, ir_ref, ic_ref, out_ref,
                 m_sc, s_sc, w_sc, q_sc, c_sc, *, inv_temp, npad):
    i = pl.program_id(0)              # anchor-row block   ("parallel")
    j = pl.program_id(1)              # contrast-col block ("arbitrary", innermost reduction)
    last_j = j == pl.num_programs(1) - 1

    @pl.when(j == 0)
    def _init():
        m_sc[...] = jnp.full_like(m_sc, _NEG)   # running row max of logits
        s_sc[...] = jnp.zeros_like(s_sc)        # running sum exp(logit - m), diag/pad excluded
        w_sc[...] = jnp.zeros_like(w_sc)        # running sum of mask weights
        q_sc[...] = jnp.zeros_like(q_sc)        # running sum of mask * (logit - m_running)
        c_sc[...] = jnp.zeros_like(c_sc)        # running count of mask > 0

    # Contract last dims of both operands: X @ Y^T with no transpose feeding the MXU.
    dn = (((1,), (1,)), ((), ()))

    # ---- logits tile + online-softmax bookkeeping (f32 accumulation on the MXU) ----
    adc = lax.dot_general(af_ref[...], cf_ref[...], dimension_numbers=dn,
                          preferred_element_type=jnp.float32) * inv_temp   # [tile, tile]
    m_prev = m_sc[...]
    m_cur = jnp.maximum(m_prev, jnp.max(adc, axis=1, keepdims=True))  # max includes diag (ref)
    rescale = jnp.exp(m_prev - m_cur)
    # Rebase q~ = sum mask*(adc - m_running) onto the new running max (uses the OLD w).
    q_sc[...] += w_sc[...] * (m_prev - m_cur)
    m_sc[...] = m_cur
    shifted = adc - m_cur                 # adc dead after this point
    p = jnp.exp(shifted)                  # padded cols give exp(-m); removed by scalar fix below

    # ---- HMLC mask tile: (labels @ labels^T) * min(1/cnt_i, 1/cnt_j) ----
    # (inverse counts precomputed in the wrapper; padded rows/cols carry 0 -> mask == 0)
    lab_gram = lax.dot_general(al_ref[...], cl_ref[...], dimension_numbers=dn,
                               preferred_element_type=jnp.float32)         # [tile, tile]
    mask = lab_gram * jnp.minimum(ir_ref[...], ic_ref[...])

    # ---- per-row reductions; diagonal masking only on the blocks that contain it ----
    # TODO(synk): if a bundle dump shows the XLU reductions as the binding slot, these sums can
    # be moved onto the MXU via dot_general against a ones vector (review item), kept on the
    # XLU here because it is the known-lowerable path.
    @pl.when(i != j)
    def _off_diag():
        s_sc[...] = s_sc[...] * rescale + jnp.sum(p, axis=1, keepdims=True)
        w_sc[...] += jnp.sum(mask, axis=1, keepdims=True)
        q_sc[...] += jnp.sum(mask * shifted, axis=1, keepdims=True)
        c_sc[...] += jnp.sum(jnp.where(mask > 0.0, 1.0, 0.0), axis=1, keepdims=True)

    @pl.when(i == j)
    def _diag():
        nd = (lax.broadcasted_iota(jnp.int32, p.shape, 0)
              != lax.broadcasted_iota(jnp.int32, p.shape, 1))
        pm = jnp.where(nd, p, 0.0)
        mm = jnp.where(nd, mask, 0.0)
        s_sc[...] = s_sc[...] * rescale + jnp.sum(pm, axis=1, keepdims=True)
        w_sc[...] += jnp.sum(mm, axis=1, keepdims=True)
        q_sc[...] += jnp.sum(mm * shifted, axis=1, keepdims=True)
        c_sc[...] += jnp.sum(jnp.where(mm > 0.0, 1.0, 0.0), axis=1, keepdims=True)

    # ---- finalize per-row mean_log_prob_pos at the last contrast block ----
    @pl.when(last_j)
    def _finalize():
        s_fin = s_sc[...]
        if npad:  # static: padded features are all-zero -> each padded col added exp(0 - m)
            s_fin = s_fin - float(npad) * jnp.exp(-m_cur)
        # sum_j mask*log_prob = q~ - log(sum_exp + 1e-12) * sum_j mask   (q~ already max-shifted)
        numer = q_sc[...] - jnp.log(s_fin + 1e-12) * w_sc[...]
        out_ref[...] = numer / (c_sc[...] + 1e-12)


def _round_up(x, m):
    return (x + m - 1) // m * m


def _pick_tile(B, D, L, feat_itemsize, sub):
    """Square tile; sized so double-buffered blocks + tile^2 temporaries stay VMEM-safe on all gens."""
    if B <= 256:
        return _round_up(B, sub)          # single block per axis (any size legal: blocks = full dims)
    budget = 44 << 20                     # conservative: fits v7x 64 MiB physical with headroom
    for t in (256, 128):                  # multi-block tiles must be lane-aligned (x128)
        need = 4 * t * D * feat_itemsize + 4 * t * L * 2 + 8 * t * t * 4
        if need <= budget:
            return t
    return 128
    # TODO(synk): rectangular tm>tn (e.g. tm=512 on v5e/v6e 128 MiB) is a further HBM-reuse win;
    # kept square here for simplicity/safety across all three generations.


def hmlc_loss(features, labels, config=Config()):
    """features: [B, D] float (f32/bf16), labels: [B, L] multi-hot. Returns scalar f32 loss."""
    if features.ndim > 2:
        features = features.reshape(features.shape[0], -1)
    B, D = features.shape
    L = labels.shape[1]
    inv_temp = float(1.0 / config.temp)
    inv_penalty = float(1.0 / (2.0 ** float(config.alpha)))

    itf = jnp.dtype(features.dtype).itemsize
    sub = 16 if features.dtype == jnp.bfloat16 else 8   # sublane rounding follows dtype packing
    tile = _pick_tile(B, D, L, itf, sub)
    b_pad = _round_up(B, tile)
    g = b_pad // tile
    npad = int(b_pad - B)

    if npad:
        features = jnp.pad(features, ((0, npad), (0, 0)))
        labels = jnp.pad(labels, ((0, npad), (0, 0)))

    # Precomputed inverse label counts (review item #1). Padded rows -> 0 (no NaN path).
    lc = jnp.sum(labels.astype(jnp.float32), axis=1)
    inv_lc = jnp.where(lc > 0.0, 1.0 / jnp.maximum(lc, 1.0), 0.0)
    inv_row = inv_lc[:, None]                      # (b_pad, 1)
    inv_col = inv_lc[None, :]                      # (1, b_pad)

    labels_bf = labels.astype(jnp.bfloat16)        # exact for {0,1}; halves label DMA + MXU work

    kernel = functools.partial(_hmlc_kernel, inv_temp=inv_temp, npad=npad)

    # Explicit VMEM budget (review item): double-buffered input blocks + tile^2 temporaries.
    blk_in = 2 * tile * D * itf + 2 * tile * L * 2 + 2 * tile * 4
    need = 2 * blk_in + 7 * tile * 4 + 8 * tile * tile * 4 + (2 << 20)
    vmem_limit = int(min(max(need, 32 << 20), 64 << 20))

    cost = pl.CostEstimate(
        flops=int(2 * b_pad * b_pad * (D + L) + 10 * b_pad * b_pad),
        transcendentals=int(b_pad * b_pad + 3 * b_pad * g),
        bytes_accessed=int((g + 1) * b_pad * (D * itf + L * 2) + 16 * b_pad),
    )

    mlpp = pl.pallas_call(
        kernel,
        out_shape=jax.ShapeDtypeStruct((b_pad, 1), jnp.float32),
        grid_spec=pltpu.PrefetchScalarGridSpec(
            num_scalar_prefetch=0,
            grid=(g, g),
            in_specs=[
                pl.BlockSpec((tile, D), lambda i, j: (i, 0)),   # anchor features (row block)
                pl.BlockSpec((tile, D), lambda i, j: (j, 0)),   # contrast features (col block)
                pl.BlockSpec((tile, L), lambda i, j: (i, 0)),   # anchor labels
                pl.BlockSpec((tile, L), lambda i, j: (j, 0)),   # contrast labels
                pl.BlockSpec((tile, 1), lambda i, j: (i, 0)),   # 1/count for anchor rows
                pl.BlockSpec((1, tile), lambda i, j: (0, j)),   # 1/count for contrast cols
            ],
            out_specs=pl.BlockSpec((tile, 1), lambda i, j: (i, 0)),
            scratch_shapes=[pltpu.VMEM((tile, 1), jnp.float32) for _ in range(5)],
        ),
        compiler_params=pltpu.CompilerParams(
            dimension_semantics=("parallel", "arbitrary"),
            vmem_limit_bytes=vmem_limit),
        cost_estimate=cost,
    )(features, features, labels_bf, labels_bf, inv_row, inv_col)

    mean_log_prob_pos = mlpp[:B, 0]
    return -jnp.mean(mean_log_prob_pos) * inv_penalty


def _hmlc_reference(features, labels, config=Config()):
    """Pure-JAX reference (mirrors the PyTorch HMLC + SupConLoss forward)."""
    features = features.astype(jnp.float32)
    labels = labels.astype(jnp.float32)
    B = features.shape[0]
    mask = labels @ labels.T
    lc = labels.sum(-1)
    t_max = jnp.maximum(lc[:, None], lc[None, :])
    mask = mask / t_max
    adc = (features @ features.T) / config.temp
    logits = adc - jnp.max(adc, axis=1, keepdims=True)
    logits_mask = 1.0 - jnp.eye(B, dtype=jnp.float32)
    mask = mask * logits_mask
    exp_logits = jnp.exp(logits) * logits_mask
    log_prob = logits - jnp.log(exp_logits.sum(1, keepdims=True) + 1e-12)
    mask_labels = jnp.where(mask > 0, 1.0, mask)
    mlpp = (mask * log_prob).sum(1) / (mask_labels.sum(1) + 1e-12)
    loss = -mlpp.mean()
    return loss / (2.0 ** config.alpha)


if __name__ == "__main__":
    key = jax.random.PRNGKey(0)

    def run_case(B, D, L, case_key):
        k1, k2 = jax.random.split(case_key)
        feats = jax.random.normal(k1, (B, D), dtype=jnp.float32)
        feats = feats / jnp.linalg.norm(feats, axis=-1, keepdims=True)
        labs = jax.random.bernoulli(k2, 0.5, (B, L)).astype(jnp.float32)
        labs = labs.at[:, 0].set(1.0)   # precondition: every row has >= 1 positive label
        out = hmlc_loss(feats, labs)
        jax.block_until_ready(out)
        ref = _hmlc_reference(feats, labs)
        assert jnp.allclose(out, ref, atol=1e-3, rtol=1e-3), (B, D, L, out, ref)

    k1, k2 = jax.random.split(key)
    run_case(12, 32, 4, k1)    # single-block path + row/col padding (tile=16, npad=4)
    run_case(272, 32, 6, k2)   # multi-block path: 2x2 grid, online-softmax rescale, padding fix
    print("KERNEL_OK")
</pallas_src>

<mosaic_0001>
module attributes {stable_mosaic.version = 11 : i64} {
  func.func @_hmlc_kernel(%arg0: i32, %arg1: i32, %arg2: memref<16x32xf32, #tpu.memory_space<vmem>>, %arg3: memref<16x32xf32, #tpu.memory_space<vmem>>, %arg4: memref<16x4xbf16, #tpu.memory_space<vmem>>, %arg5: memref<16x4xbf16, #tpu.memory_space<vmem>>, %arg6: memref<16x1xf32, #tpu.memory_space<vmem>>, %arg7: memref<1x16xf32, #tpu.memory_space<vmem>>, %arg8: memref<16x1xf32, #tpu.memory_space<vmem>>, %arg9: memref<16x1xf32, #tpu.memory_space<vmem>>, %arg10: memref<16x1xf32, #tpu.memory_space<vmem>>, %arg11: memref<16x1xf32, #tpu.memory_space<vmem>>, %arg12: memref<16x1xf32, #tpu.memory_space<vmem>>, %arg13: memref<16x1xf32, #tpu.memory_space<vmem>>) attributes {dimension_semantics = [#tpu.dimension_semantics<parallel>, #tpu.dimension_semantics<arbitrary>], iteration_bounds = array<i64: 1, 1>, scalar_prefetch = 0 : i64, scratch_operands = 5 : i64, tpu.core_type = #tpu.core_type<tc>, window_params = [{transform_indices = @transform_0, window_bounds = array<i64: 16, 32>}, {transform_indices = @transform_1, window_bounds = array<i64: 16, 32>}, {transform_indices = @transform_2, window_bounds = array<i64: 16, 4>}, {transform_indices = @transform_3, window_bounds = array<i64: 16, 4>}, {transform_indices = @transform_4, window_bounds = array<i64: 16, 1>}, {transform_indices = @transform_5, window_bounds = array<i64: 1, 16>}, {transform_indices = @transform_6, window_bounds = array<i64: 16, 1>}]} {
    %c0_i32 = arith.constant 0 : i32
    %0 = arith.cmpi eq, %arg1, %c0_i32 : i32
    %c0_i32_0 = arith.constant 0 : i32
    %1 = arith.cmpi eq, %arg1, %c0_i32_0 : i32
    %2 = arith.extui %1 : i1 to i32
    %c0_i32_1 = arith.constant 0 : i32
    %3 = arith.cmpi ne, %2, %c0_i32_1 : i32
    scf.if %3 {
      %cst_29 = arith.constant -1.000000e+30 : f32
      %42 = vector.broadcast %cst_29 : f32 to vector<16x1xf32>
      %c0_30 = arith.constant 0 : index
      %c0_31 = arith.constant 0 : index
      %43 = vector.load %arg9[%c0_30, %c0_31] : memref<16x1xf32, #tpu.memory_space<vmem>>, vector<16x1xf32>
      tpu.vector_store %arg9[%c0_30, %c0_31], %42 {strides = array<i32>} : memref<16x1xf32, #tpu.memory_space<vmem>>, vector<16x1xf32>,
      %cst_32 = arith.constant 0.000000e+00 : f32
      %44 = vector.broadcast %cst_32 : f32 to vector<16x1xf32>
      %c0_33 = arith.constant 0 : index
      %c0_34 = arith.constant 0 : index
      %45 = vector.load %arg10[%c0_33, %c0_34] : memref<16x1xf32, #tpu.memory_space<vmem>>, vector<16x1xf32>
      tpu.vector_store %arg10[%c0_33, %c0_34], %44 {strides = array<i32>} : memref<16x1xf32, #tpu.memory_space<vmem>>, vector<16x1xf32>,
      %cst_35 = arith.constant 0.000000e+00 : f32
      %46 = vector.broadcast %cst_35 : f32 to vector<16x1xf32>
      %c0_36 = arith.constant 0 : index
      %c0_37 = arith.constant 0 : index
      %47 = vector.load %arg11[%c0_36, %c0_37] : memref<16x1xf32, #tpu.memory_space<vmem>>, vector<16x1xf32>
      tpu.vector_store %arg11[%c0_36, %c0_37], %46 {strides = array<i32>} : memref<16x1xf32, #tpu.memory_space<vmem>>, vector<16x1xf32>,
      %cst_38 = arith.constant 0.000000e+00 : f32
      %48 = vector.broadcast %cst_38 : f32 to vector<16x1xf32>
      %c0_39 = arith.constant 0 : index
      %c0_40 = arith.constant 0 : index
      %49 = vector.load %arg12[%c0_39, %c0_40] : memref<16x1xf32, #tpu.memory_space<vmem>>, vector<16x1xf32>
      tpu.vector_store %arg12[%c0_39, %c0_40], %48 {strides = array<i32>} : memref<16x1xf32, #tpu.memory_space<vmem>>, vector<16x1xf32>,
      %cst_41 = arith.constant 0.000000e+00 : f32
      %50 = vector.broadcast %cst_41 : f32 to vector<16x1xf32>
      %c0_42 = arith.constant 0 : index
      %c0_43 = arith.constant 0 : index
      %51 = vector.load %arg13[%c0_42, %c0_43] : memref<16x1xf32, #tpu.memory_space<vmem>>, vector<16x1xf32>
      tpu.vector_store %arg13[%c0_42, %c0_43], %50 {strides = array<i32>} : memref<16x1xf32, #tpu.memory_space<vmem>>, vector<16x1xf32>,
    } else {
    }
    %c0 = arith.constant 0 : index
    %c0_2 = arith.constant 0 : index
    %4 = vector.load %arg2[%c0, %c0_2] : memref<16x32xf32, #tpu.memory_space<vmem>>, vector<16x32xf32>
    %c0_3 = arith.constant 0 : index
    %c0_4 = arith.constant 0 : index
    %5 = vector.load %arg3[%c0_3, %c0_4] : memref<16x32xf32, #tpu.memory_space<vmem>>, vector<16x32xf32>
    %cst = arith.constant dense<0.000000e+00> : vector<16x16xf32>
    %6 = tpu.matmul %4, %5, %cst {dimension_numbers = #tpu.dot_dimension_numbers<[1], [1], [0], [0], [0, 0, 1, 0], [], []>} : vector<16x32xf32>, vector<16x32xf32>, vector<16x16xf32> -> vector<16x16xf32>
    %cst_5 = arith.constant 14.2857141 : f32
    %7 = vector.broadcast %cst_5 : f32 to vector<16x16xf32>
    %8 = arith.mulf %6, %7 : vector<16x16xf32>
    %c0_6 = arith.constant 0 : index
    %c0_7 = arith.constant 0 : index
    %9 = vector.load %arg9[%c0_6, %c0_7] : memref<16x1xf32, #tpu.memory_space<vmem>>, vector<16x1xf32>
    %cst_8 = arith.constant dense<0xFF800000> : vector<16xf32>
    %10 = vector.multi_reduction <maximumf>, %8, %cst_8 [1] : vector<16x16xf32> to vector<16xf32>
    %11 = vector.shape_cast %10 : vector<16xf32> to vector<16x1xf32>
    %12 = arith.maximumf %9, %11 : vector<16x1xf32>
    %13 = arith.subf %9, %12 : vector<16x1xf32>
    %14 = math.exp %13 : vector<16x1xf32>
    %c0_9 = arith.constant 0 : index
    %c0_10 = arith.constant 0 : index
    %15 = vector.load %arg12[%c0_9, %c0_10] : memref<16x1xf32, #tpu.memory_space<vmem>>, vector<16x1xf32>
    %c0_11 = arith.constant 0 : index
    %c0_12 = arith.constant 0 : index
    %16 = vector.load %arg11[%c0_11, %c0_12] : memref<16x1xf32, #tpu.memory_space<vmem>>, vector<16x1xf32>
    %17 = arith.subf %9, %12 : vector<16x1xf32>
    %18 = arith.mulf %16, %17 : vector<16x1xf32>
    %19 = arith.addf %15, %18 : vector<16x1xf32>
    %c0_13 = arith.constant 0 : index
    %c0_14 = arith.constant 0 : index
    %20 = vector.load %arg12[%c0_13, %c0_14] : memref<16x1xf32, #tpu.memory_space<vmem>>, vector<16x1xf32>
    tpu.vector_store %arg12[%c0_13, %c0_14], %19 {strides = array<i32>} : memref<16x1xf32, #tpu.memory_space<vmem>>, vector<16x1xf32>,
    %c0_15 = arith.constant 0 : index
    %c0_16 = arith.constant 0 : index
    %21 = vector.load %arg9[%c0_15, %c0_16] : memref<16x1xf32, #tpu.memory_space<vmem>>, vector<16x1xf32>
    tpu.vector_store %arg9[%c0_15, %c0_16], %12 {strides = array<i32>} : memref<16x1xf32, #tpu.memory_space<vmem>>, vector<16x1xf32>,
    %22 = vector.broadcast %12 : vector<16x1xf32> to vector<16x16xf32>
    %23 = arith.subf %8, %22 : vector<16x16xf32>
    %24 = math.exp %23 : vector<16x16xf32>
    %c0_17 = arith.constant 0 : index
    %c0_18 = arith.constant 0 : index
    %25 = vector.load %arg4[%c0_17, %c0_18] : memref<16x4xbf16, #tpu.memory_space<vmem>>, vector<16x4xbf16>
    %c0_19 = arith.constant 0 : index
    %c0_20 = arith.constant 0 : index
    %26 = vector.load %arg5[%c0_19, %c0_20] : memref<16x4xbf16, #tpu.memory_space<vmem>>, vector<16x4xbf16>
    %cst_21 = arith.constant dense<0.000000e+00> : vector<16x16xf32>
    %27 = tpu.matmul %25, %26, %cst_21 {dimension_numbers = #tpu.dot_dimension_numbers<[1], [1], [0], [0], [0, 0, 1, 0], [], []>} : vector<16x4xbf16>, vector<16x4xbf16>, vector<16x16xf32> -> vector<16x16xf32>
    %c0_22 = arith.constant 0 : index
    %c0_23 = arith.constant 0 : index
    %28 = vector.load %arg6[%c0_22, %c0_23] : memref<16x1xf32, #tpu.memory_space<vmem>>, vector<16x1xf32>
    %c0_24 = arith.constant 0 : index
    %c0_25 = arith.constant 0 : index
    %29 = vector.load %arg7[%c0_24, %c0_25] : memref<1x16xf32, #tpu.memory_space<vmem>>, vector<1x16xf32>
    %30 = vector.broadcast %28 : vector<16x1xf32> to vector<16x16xf32>
    %31 = vector.broadcast %29 : vector<1x16xf32> to vector<16x16xf32>
    %32 = arith.minimumf %30, %31 : vector<16x16xf32>
    %33 = arith.mulf %27, %32 : vector<16x16xf32>
    %34 = arith.cmpi ne, %arg0, %arg1 : i32
    %35 = arith.extui %34 : i1 to i32
    %c0_i32_26 = arith.constant 0 : i32
    %36 = arith.cmpi ne, %35, %c0_i32_26 : i32
    scf.if %36 {
      %c0_29 = arith.constant 0 : index
      %c0_30 = arith.constant 0 : index
      %42 = vector.load %arg10[%c0_29, %c0_30] : memref<16x1xf32, #tpu.memory_space<vmem>>, vector<16x1xf32>
      %43 = arith.mulf %42, %14 : vector<16x1xf32>
      %cst_31 = arith.constant dense<0.000000e+00> : vector<16xf32>
      %44 = vector.multi_reduction <add>, %24, %cst_31 [1] : vector<16x16xf32> to vector<16xf32>
      %45 = vector.shape_cast %44 : vector<16xf32> to vector<16x1xf32>
      %46 = arith.addf %43, %45 : vector<16x1xf32>
      %c0_32 = arith.constant 0 : index
      %c0_33 = arith.constant 0 : index
      %47 = vector.load %arg10[%c0_32, %c0_33] : memref<16x1xf32, #tpu.memory_space<vmem>>, vector<16x1xf32>
      tpu.vector_store %arg10[%c0_32, %c0_33], %46 {strides = array<i32>} : memref<16x1xf32, #tpu.memory_space<vmem>>, vector<16x1xf32>,
      %c0_34 = arith.constant 0 : index
      %c0_35 = arith.constant 0 : index
      %48 = vector.load %arg11[%c0_34, %c0_35] : memref<16x1xf32, #tpu.memory_space<vmem>>, vector<16x1xf32>
      %cst_36 = arith.constant dense<0.000000e+00> : vector<16xf32>
      %49 = vector.multi_reduction <add>, %33, %cst_36 [1] : vector<16x16xf32> to vector<16xf32>
      %50 = vector.shape_cast %49 : vector<16xf32> to vector<16x1xf32>
      %51 = arith.addf %48, %50 : vector<16x1xf32>
      %c0_37 = arith.constant 0 : index
      %c0_38 = arith.constant 0 : index
      %52 = vector.load %arg11[%c0_37, %c0_38] : memref<16x1xf32, #tpu.memory_space<vmem>>, vector<16x1xf32>
      tpu.vector_store %arg11[%c0_37, %c0_38], %51 {strides = array<i32>} : memref<16x1xf32, #tpu.memory_space<vmem>>, vector<16x1xf32>,
      %c0_39 = arith.constant 0 : index
      %c0_40 = arith.constant 0 : index
      %53 = vector.load %arg12[%c0_39, %c0_40] : memref<16x1xf32, #tpu.memory_space<vmem>>, vector<16x1xf32>
      %54 = arith.mulf %33, %23 : vector<16x16xf32>
      %cst_41 = arith.constant dense<0.000000e+00> : vector<16xf32>
      %55 = vector.multi_reduction <add>, %54, %cst_41 [1] : vector<16x16xf32> to vector<16xf32>
      %56 = vector.shape_cast %55 : vector<16xf32> to vector<16x1xf32>
      %57 = arith.addf %53, %56 : vector<16x1xf32>
      %c0_42 = arith.constant 0 : index
      %c0_43 = arith.constant 0 : index
      %58 = vector.load %arg12[%c0_42, %c0_43] : memref<16x1xf32, #tpu.memory_space<vmem>>, vector<16x1xf32>
      tpu.vector_store %arg12[%c0_42, %c0_43], %57 {strides = array<i32>} : memref<16x1xf32, #tpu.memory_space<vmem>>, vector<16x1xf32>,
      %c0_44 = arith.constant 0 : index
      %c0_45 = arith.constant 0 : index
      %59 = vector.load %arg13[%c0_44, %c0_45] : memref<16x1xf32, #tpu.memory_space<vmem>>, vector<16x1xf32>
      %cst_46 = arith.constant 0.000000e+00 : f32
      %60 = vector.broadcast %cst_46 : f32 to vector<16x16xf32>
      %61 = arith.cmpf ogt, %33, %60 : vector<16x16xf32>
      %cst_47 = arith.constant 1.000000e+00 : f32
      %cst_48 = arith.constant 0.000000e+00 : f32
      %62 = vector.broadcast %cst_47 : f32 to vector<16x16xf32>
      %63 = vector.broadcast %cst_48 : f32 to vector<16x16xf32>
      %64 = arith.select %61, %62, %63 : vector<16x16xi1>, vector<16x16xf32>
      %cst_49 = arith.constant dense<0.000000e+00> : vector<16xf32>
      %65 = vector.multi_reduction <add>, %64, %cst_49 [1] : vector<16x16xf32> to vector<16xf32>
      %66 = vector.shape_cast %65 : vector<16xf32> to vector<16x1xf32>
      %67 = arith.addf %59, %66 : vector<16x1xf32>
      %c0_50 = arith.constant 0 : index
      %c0_51 = arith.constant 0 : index
      %68 = vector.load %arg13[%c0_50, %c0_51] : memref<16x1xf32, #tpu.memory_space<vmem>>, vector<16x1xf32>
      tpu.vector_store %arg13[%c0_50, %c0_51], %67 {strides = array<i32>} : memref<16x1xf32, #tpu.memory_space<vmem>>, vector<16x1xf32>,
    } else {
    }
    %37 = arith.cmpi eq, %arg0, %arg1 : i32
    %38 = arith.extui %37 : i1 to i32
    %c0_i32_27 = arith.constant 0 : i32
    %39 = arith.cmpi ne, %38, %c0_i32_27 : i32
    scf.if %39 {
      %42 = tpu.iota {dimensions = array<i32: 0>} : vector<16x16xi32>
      %43 = tpu.iota {dimensions = array<i32: 1>} : vector<16x16xi32>
      %44 = arith.cmpi ne, %42, %43 : vector<16x16xi32>
      %cst_29 = arith.constant 0.000000e+00 : f32
      %45 = vector.broadcast %cst_29 : f32 to vector<16x16xf32>
      %46 = arith.select %44, %24, %45 : vector<16x16xi1>, vector<16x16xf32>
      %cst_30 = arith.constant 0.000000e+00 : f32
      %47 = vector.broadcast %cst_30 : f32 to vector<16x16xf32>
      %48 = arith.select %44, %33, %47 : vector<16x16xi1>, vector<16x16xf32>
      %c0_31 = arith.constant 0 : index
      %c0_32 = arith.constant 0 : index
      %49 = vector.load %arg10[%c0_31, %c0_32] : memref<16x1xf32, #tpu.memory_space<vmem>>, vector<16x1xf32>
      %50 = arith.mulf %49, %14 : vector<16x1xf32>
      %cst_33 = arith.constant dense<0.000000e+00> : vector<16xf32>
      %51 = vector.multi_reduction <add>, %46, %cst_33 [1] : vector<16x16xf32> to vector<16xf32>
      %52 = vector.shape_cast %51 : vector<16xf32> to vector<16x1xf32>
      %53 = arith.addf %50, %52 : vector<16x1xf32>
      %c0_34 = arith.constant 0 : index
      %c0_35 = arith.constant 0 : index
      %54 = vector.load %arg10[%c0_34, %c0_35] : memref<16x1xf32, #tpu.memory_space<vmem>>, vector<16x1xf32>
      tpu.vector_store %arg10[%c0_34, %c0_35], %53 {strides = array<i32>} : memref<16x1xf32, #tpu.memory_space<vmem>>, vector<16x1xf32>,
      %c0_36 = arith.constant 0 : index
      %c0_37 = arith.constant 0 : index
      %55 = vector.load %arg11[%c0_36, %c0_37] : memref<16x1xf32, #tpu.memory_space<vmem>>, vector<16x1xf32>
      %cst_38 = arith.constant dense<0.000000e+00> : vector<16xf32>
      %56 = vector.multi_reduction <add>, %48, %cst_38 [1] : vector<16x16xf32> to vector<16xf32>
      %57 = vector.shape_cast %56 : vector<16xf32> to vector<16x1xf32>
      %58 = arith.addf %55, %57 : vector<16x1xf32>
      %c0_39 = arith.constant 0 : index
      %c0_40 = arith.constant 0 : index
      %59 = vector.load %arg11[%c0_39, %c0_40] : memref<16x1xf32, #tpu.memory_space<vmem>>, vector<16x1xf32>
      tpu.vector_store %arg11[%c0_39, %c0_40], %58 {strides = array<i32>} : memref<16x1xf32, #tpu.memory_space<vmem>>, vector<16x1xf32>,
      %c0_41 = arith.constant 0 : index
      %c0_42 = arith.constant 0 : index
      %60 = vector.load %arg12[%c0_41, %c0_42] : memref<16x1xf32, #tpu.memory_space<vmem>>, vector<16x1xf32>
      %61 = arith.mulf %48, %23 : vector<16x16xf32>
      %cst_43 = arith.constant dense<0.000000e+00> : vector<16xf32>
      %62 = vector.multi_reduction <add>, %61, %cst_43 [1] : vector<16x16xf32> to vector<16xf32>
      %63 = vector.shape_cast %62 : vector<16xf32> to vector<16x1xf32>
      %64 = arith.addf %60, %63 : vector<16x1xf32>
      %c0_44 = arith.constant 0 : index
      %c0_45 = arith.constant 0 : index
      %65 = vector.load %arg12[%c0_44, %c0_45] : memref<16x1xf32, #tpu.memory_space<vmem>>, vector<16x1xf32>
      tpu.vector_store %arg12[%c0_44, %c0_45], %64 {strides = array<i32>} : memref<16x1xf32, #tpu.memory_space<vmem>>, vector<16x1xf32>,
      %c0_46 = arith.constant 0 : index
      %c0_47 = arith.constant 0 : index
      %66 = vector.load %arg13[%c0_46, %c0_47] : memref<16x1xf32, #tpu.memory_space<vmem>>, vector<16x1xf32>
      %cst_48 = arith.constant 0.000000e+00 : f32
      %67 = vector.broadcast %cst_48 : f32 to vector<16x16xf32>
      %68 = arith.cmpf ogt, %48, %67 : vector<16x16xf32>
      %cst_49 = arith.constant 1.000000e+00 : f32
      %cst_50 = arith.constant 0.000000e+00 : f32
      %69 = vector.broadcast %cst_49 : f32 to vector<16x16xf32>
      %70 = vector.broadcast %cst_50 : f32 to vector<16x16xf32>
      %71 = arith.select %68, %69, %70 : vector<16x16xi1>, vector<16x16xf32>
      %cst_51 = arith.constant dense<0.000000e+00> : vector<16xf32>
      %72 = vector.multi_reduction <add>, %71, %cst_51 [1] : vector<16x16xf32> to vector<16xf32>
      %73 = vector.shape_cast %72 : vector<16xf32> to vector<16x1xf32>
      %74 = arith.addf %66, %73 : vector<16x1xf32>
      %c0_52 = arith.constant 0 : index
      %c0_53 = arith.constant 0 : index
      %75 = vector.load %arg13[%c0_52, %c0_53] : memref<16x1xf32, #tpu.memory_space<vmem>>, vector<16x1xf32>
      tpu.vector_store %arg13[%c0_52, %c0_53], %74 {strides = array<i32>} : memref<16x1xf32, #tpu.memory_space<vmem>>, vector<16x1xf32>,
    } else {
    }
    %40 = arith.extui %0 : i1 to i32
    %c0_i32_28 = arith.constant 0 : i32
    %41 = arith.cmpi ne, %40, %c0_i32_28 : i32
    scf.if %41 {
      %c0_29 = arith.constant 0 : index
      %c0_30 = arith.constant 0 : index
      %42 = vector.load %arg10[%c0_29, %c0_30] : memref<16x1xf32, #tpu.memory_space<vmem>>, vector<16x1xf32>
      %cst_31 = arith.constant 0.000000e+00 : f32
      %43 = vector.broadcast %cst_31 : f32 to vector<16x1xf32>
      %44 = arith.subf %43, %12 : vector<16x1xf32>
      %45 = math.exp %44 : vector<16x1xf32>
      %cst_32 = arith.constant 4.000000e+00 : f32
      %46 = vector.broadcast %cst_32 : f32 to vector<16x1xf32>
      %47 = arith.mulf %46, %45 : vector<16x1xf32>
      %48 = arith.subf %42, %47 : vector<16x1xf32>
      %c0_33 = arith.constant 0 : index
      %c0_34 = arith.constant 0 : index
      %49 = vector.load %arg12[%c0_33, %c0_34] : memref<16x1xf32, #tpu.memory_space<vmem>>, vector<16x1xf32>
      %cst_35 = arith.constant 9.99999996E-13 : f32
      %50 = vector.broadcast %cst_35 : f32 to vector<16x1xf32>
      %51 = arith.addf %48, %50 : vector<16x1xf32>
      %52 = math.log %51 : vector<16x1xf32>
      %c0_36 = arith.constant 0 : index
      %c0_37 = arith.constant 0 : index
      %53 = vector.load %arg11[%c0_36, %c0_37] : memref<16x1xf32, #tpu.memory_space<vmem>>, vector<16x1xf32>
      %54 = arith.mulf %52, %53 : vector<16x1xf32>
      %55 = arith.subf %49, %54 : vector<16x1xf32>
      %c0_38 = arith.constant 0 : index
      %c0_39 = arith.constant 0 : index
      %56 = vector.load %arg13[%c0_38, %c0_39] : memref<16x1xf32, #tpu.memory_space<vmem>>, vector<16x1xf32>
      %cst_40 = arith.constant 9.99999996E-13 : f32
      %57 = vector.broadcast %cst_40 : f32 to vector<16x1xf32>
      %58 = arith.addf %56, %57 : vector<16x1xf32>
      %59 = arith.divf %55, %58 : vector<16x1xf32>
      %c0_41 = arith.constant 0 : index
      %c0_42 = arith.constant 0 : index
      %60 = vector.load %arg8[%c0_41, %c0_42] : memref<16x1xf32, #tpu.memory_space<vmem>>, vector<16x1xf32>
      tpu.vector_store %arg8[%c0_41, %c0_42], %59 {strides = array<i32>} : memref<16x1xf32, #tpu.memory_space<vmem>>, vector<16x1xf32>,
    } else {
    }
    return
  }
  func.func @transform_0(%arg0: i32, %arg1: i32) -> (i32, i32) {
    %c0_i32 = arith.constant 0 : i32
    %c0_i32_0 = arith.constant 0 : i32
    return %arg0, %c0_i32 : i32, i32
  }
  func.func @transform_1(%arg0: i32, %arg1: i32) -> (i32, i32) {
    %c0_i32 = arith.constant 0 : i32
    %c0_i32_0 = arith.constant 0 : i32
    return %arg1, %c0_i32 : i32, i32
  }
  func.func @transform_2(%arg0: i32, %arg1: i32) -> (i32, i32) {
    %c0_i32 = arith.constant 0 : i32
    %c0_i32_0 = arith.constant 0 : i32
    return %arg0, %c0_i32 : i32, i32
  }
  func.func @transform_3(%arg0: i32, %arg1: i32) -> (i32, i32) {
    %c0_i32 = arith.constant 0 : i32
    %c0_i32_0 = arith.constant 0 : i32
    return %arg1, %c0_i32 : i32, i32
  }
  func.func @transform_4(%arg0: i32, %arg1: i32) -> (i32, i32) {
    %c0_i32 = arith.constant 0 : i32
    %c0_i32_0 = arith.constant 0 : i32
    return %arg0, %c0_i32 : i32, i32
  }
  func.func @transform_5(%arg0: i32, %arg1: i32) -> (i32, i32) {
    %c0_i32 = arith.constant 0 : i32
    %c0_i32_0 = arith.constant 0 : i32
    return %c0_i32, %arg1 : i32, i32
  }
  func.func @transform_6(%arg0: i32, %arg1: i32) -> (i32, i32) {
    %c0_i32 = arith.constant 0 : i32
    %c0_i32_0 = arith.constant 0 : i32
    return %arg0, %c0_i32 : i32, i32
  }
}

</mosaic_0001>

<bundles_post_ra>
// kernel: tpu_custom_call.1
= control target key start
LH: loop header
LB: loop body
LE: loop exit
PB: predicated region body
PF: predicated region fallthrough
CT: control target
= control target key end

     0   :  { %vm43_vm0 = vcmask 261120   ;;  %vm193_vm2 = vcmask 31744   ;;  %v499_v5 = vmov 0.0   ;;  %vm500_vm3 = vmmov 0   ;;  %s647_s1 = inlined_call_operand.vmem [shape: f32[16,32], index: 1, kind: input, shape index: {}]   ;;  %s648_s0 = inlined_call_operand.vmem [shape: f32[16,32], index: 0, kind: input, shape index: {}]   ;;  %s649_s3 = inlined_call_operand.vmem [shape: bf16[16,4], index: 3, kind: input, shape index: {}]   ;;  %s650_s2 = inlined_call_operand.vmem [shape: bf16[16,4], index: 2, kind: input, shape index: {}]   ;;  %s651_s4 = inlined_call_operand.vmem [shape: f32[16,1], index: 4, kind: input, shape index: {}]   ;;  %s652_s5 = inlined_call_operand.vmem [shape: f32[1,16], index: 5, kind: input, shape index: {}]   ;;  %s653_s6 = inlined_call_operand.vmem [shape: f32[16,1], index: 6, kind: output, shape index: {}]  }
   0x1   :  { %v41_v0 = vld [vmem:[%s647_s1] sm:$0xff]  ;;  %v42_v1 = vld [vmem:[%s647_s1 + $0x8] sm:$0xff]  ;;  %vm466_vm1 = vmpackc.low %vm43_vm0, %vm43_vm0  ;;  %459 = vmatprep.subr.bf16.mxu1 %v499_v5  ;;  %461 = vmatprep.mubr.msk.bf16.mxu1 %vm500_vm3, %v499_v5  ;;  %v501_v7 = vmov 0   ;;  %vm28_vm4 = vcmask 7168   ;;  %v502_v10 = vmov -1e+30   ;;  %v328_v41 = vlaneseq }
   0x2   :  { %v465_v2 = vpack.c.bf16 %v42_v1, %v41_v0  ;;  %v39_v3 = vld [vmem:[%s648_s0] sm:$0xff]  ;;  %v40_v4 = vld [vmem:[%s648_s0 + $0x8] sm:$0xff]  ;;  %476 = vset.pattern.permute.xlu0 %v501_v7  ;;  %475 = vset.pattern.permute.xlu1 %v501_v7  ;;  %29 = vst.msk [vmem:[#allocation2] sm:$0xff] %vm28_vm4, %v502_v10  ;;  %33 = vst.msk [vmem:[#allocation4] sm:$0xff] %vm28_vm4, %v499_v5  ;;  %vm135_vm5 = vcmask 130048  }
   0x3   :  { %456 = vmatprep.mubr.msk.f32.mxu0 %vm43_vm0, %v39_v3  ;;  %v477_v6 = vld [vmem:[%s649_s3] sm:$0xff]   ;;  %35 = vst.msk [vmem:[#allocation5] sm:$0xff] %vm28_vm4, %v499_v5  ;;  %30 = vst.msk [vmem:[#allocation2 + $0x8] sm:$0xff] %vm28_vm4, %v502_v10  ;;  %v242_v34 = vld [vmem:[%s651_s4 + $0x8] sm:$0xff]  ;;  %v329_v43 = vshrl.u32 %v328_v41, 7  ;;  %v332_v44 = vand.u32 127, %v328_v41 }
   0x4   :  { %467 = vmatprep.subr.msk.bf16.mxu0 %vm466_vm1, %v465_v2  ;;  %v198_v8 = vsel %vm193_vm2, %v477_v6, 0  ;;  %v478_v9 = vld [vmem:[%s650_s2] sm:$0xff]   ;;  %31 = vst.msk [vmem:[#allocation3] sm:$0xff] %vm28_vm4, %v499_v5  ;;  %32 = vst.msk [vmem:[#allocation3 + $0x8] sm:$0xff] %vm28_vm4, %v499_v5 }
   0x5   :  { %470 = vmatpush3.bf16.xpose.msk.msra.mxu0 %vm466_vm1, %v465_v2  ;;  %460 = vmatpush3.bf16.xpose.msra.mxu1 %v198_v8  ;;  %34 = vst.msk [vmem:[#allocation4 + $0x8] sm:$0xff] %vm28_vm4, %v499_v5  ;;  %36 = vst.msk [vmem:[#allocation5 + $0x8] sm:$0xff] %vm28_vm4, %v499_v5  ;;  %v241_v17 = vld [vmem:[%s651_s4] sm:$0xff]  ;;  %vm333_vm6 = vcmp.ne.s32.totalorder %v329_v43, %v332_v44  ;;  %v330_v57 = vadd.s32 8, %v329_v43 }
   0x6   :  { %37 = vst.msk [vmem:[#allocation6] sm:$0xff] %vm28_vm4, %v499_v5  ;;  %38 = vst.msk [vmem:[#allocation6 + $0x8] sm:$0xff] %vm28_vm4, %v499_v5  ;;  %v445_v39 = vld [vmem:[%s652_s5] ss:$0 sm:$0xff] }
   0x7   :  { %vm334_vm8 = vcmp.ne.s32.totalorder %v330_v57, %v332_v44 }
   0x9   :  { %v133_v20 = vld [vmem:[#allocation2] sm:$0xff] }
   0xa   :  { %v583_v23 = vld [vmem:[#allocation4] sm:$0xff]  ;;  %v134_v24 = vld [vmem:[#allocation2 + $0x8] sm:$0xff]  ;;  %v150_v26 = vld [vmem:[#allocation5] sm:$0xff] }
   0xc   :  { %457 = vmatmul.mubr.msk.f32.vlgmr.msra.gmra.mrb[0].mxu0 %vm43_vm0, %v40_v4  ;;  %462 = vmatmul.mubr.msk.bf16.vlgmr.msra.gmra.mrb[0].mxu1 %vm193_vm2, %v478_v9  ;;  %v595_v30 = vld [vmem:[#allocation4 + $0x8] sm:$0xff]  ;;  %v151_v33 = vld [vmem:[#allocation5 + $0x8] sm:$0xff] }
   0xd   :  { %v379_v10 = vld [vmem:[#allocation6] sm:$0xff] }
  0xdf   :  { %v458_v11 = vpop.f32.mrb[0].mxu0  ;;  %v234_v18 = vpop.f32.mrb[0].mxu1 }
  0xe0   :  { %v122_v12 = vpop.f32.mrb[1].mxu0  ;;  %v132_v14 = vmul.f32 14.285714, %v458_v11  ;;  %v463_v19 = vpop.f32.mrb[1].mxu1 }
  0xe1   :  { %v131_v13 = vmul.f32 14.285714, %v122_v12  ;;  %v237_v37 = vpop.f32.mrb[2].mxu1 }
  0xe2   :  { %v139_v16 = vsel %vm135_vm5, %v132_v14, -inf  ;;  %v464_v38 = vpop.f32.mrb[3].mxu1 }
  0xe3   :  { %v136_v15 = vsel %vm135_vm5, %v131_v13, -inf }
  0xe4   :  { %137 = vmax.xlane.f32.xlu0 %v136_v15 }
  0xe8   :  { %140 = vmax.xlane.f32.xlu0 %v139_v16 }
  0xfe   :  { %246 = vperm.xlu0 %476, %v241_v17  }
 0x171   :  { %v138_v21 = vpop.xlane.xlu0 %137 }
 0x172   :  { %v581_v22 = vmax.f32 %v133_v20, %v138_v21 }
 0x174   :  { %v586_v25 = vsub.f32 %v133_v20, %v581_v22  ;;  %161 = vst.msk [vmem:[#allocation2] sm:$0xff] %vm28_vm4, %v581_v22  ;;  %165 = vperm.xlu1 %475, %v581_v22   ;;  %v400_v16 = vsub.f32 0.0, %v581_v22  ;;  %v340_v20 = vld [vmem:[#allocation3 + $0x8] sm:$0xff] }
 0x175   :  { %v141_v27 = vpop.xlane.xlu0 %140 }
 0x176   :  { %v154_v28 = vmul.f32 %v583_v23, %v586_v25  ;;  %v593_v29 = vmax.f32 %v134_v24, %v141_v27  ;;  %v402_v19 = vmul.f32 1.442695, %v400_v16  ;;  %v339_v27 = vld [vmem:[#allocation3] sm:$0xff] }
 0x178   :  { %v156_v31 = vadd.f32 %v154_v28, %v150_v26  ;;  %v598_v32 = vsub.f32 %v134_v24, %v593_v29  ;;  %162 = vst.msk [vmem:[#allocation2 + $0x8] sm:$0xff] %vm28_vm4, %v593_v29  ;;  %170 = vperm.xlu1 %475, %v593_v29   ;;  %v401_v15 = vsub.f32 0.0, %v593_v29 }
 0x17a   :  { %159 = vst.msk [vmem:[#allocation5] sm:$0xff] %vm28_vm4, %v156_v31  ;;  %v155_v35 = vmul.f32 %v595_v30, %v598_v32  ;;  %v404_v17 = vmul.f32 1.442695, %v401_v15 }
 0x17c   :  { %v157_v36 = vadd.f32 %v155_v35, %v151_v33  ;;  %251 = vperm.xlu1 %475, %v242_v34   ;;  %v380_v33 = vld [vmem:[#allocation6 + $0x8] sm:$0xff] }
 0x17d   :  { %v247_v40 = vpop.permute.xlu0 %246 }
 0x17e   :  { %160 = vst.msk [vmem:[#allocation5 + $0x8] sm:$0xff] %vm28_vm4, %v157_v36  ;;  %v260_v42 = vmin.f32 %v247_v40, %v445_v39 }
 0x180   :  { %v262_v45 = vmul.f32 %v260_v42, %v234_v18 }
 0x182   :  { %v337_v46 = vsel %vm333_vm6, %v262_v45, 0.0 }
 0x183   :  { %vm381_vm7 = vcmp.gt.f32.partialorder %v337_v46, 0.0  ;;  %v355_v4 = vsel %vm135_vm5, %v337_v46, 0.0 }
 0x184   :  { %v383_v47 = vsel %vm381_vm7, 1.0, %v499_v5 }
 0x185   :  { %v385_v48 = vsel %vm135_vm5, %v383_v47, 0.0 }
 0x186   :  { %386 = vadd.xlane.f32.xlu0 %v385_v48 }
 0x1f3   :  { %v166_v49 = vpop.permute.xlu1 %165 }
 0x1f4   :  { %v173_v50 = vsub.f32 %v131_v13, %v166_v49 }
 0x1f6   :  { %v175_v51 = vmul.f32 1.442695, %v173_v50  ;;  %v367_v7 = vmul.f32 %v337_v46, %v173_v50  ;;  %v365_v50 = vld [vmem:[#allocation5] sm:$0xff] }
 0x1f7   :  { %v171_v52 = vpop.permute.xlu1 %170 }
 0x1f8   :  { %v174_v53 = vsub.f32 %v132_v14, %v171_v52  ;;  %479 = vpow2.f32 %v175_v51  ;;  %v369_v8 = vsel %vm135_vm5, %v367_v7, 0.0  ;;  %v146_v14 = vmul.f32 1.442695, %v586_v25 }
 0x1fa   :  { %v177_v54 = vmul.f32 1.442695, %v174_v53 }
 0x1fb   :  { %v252_v55 = vpop.permute.xlu1 %251 }
 0x1fc   :  { %481 = vpow2.f32 %v177_v54  ;;  %v261_v56 = vmin.f32 %v252_v55, %v445_v39 }
 0x1fe   :  { %v263_v58 = vmul.f32 %v261_v56, %v237_v37 }
 0x200   :  { %v338_v61 = vsel %vm334_vm8, %v263_v58, 0.0 }
 0x201   :  { %vm382_vm9 = vcmp.gt.f32.partialorder %v338_v61, 0.0  ;;  %v358_v6 = vsel %vm135_vm5, %v338_v61, 0.0  ;;  %v368_v9 = vmul.f32 %v338_v61, %v174_v53 }
 0x202   :  { %v480_v59 = vpop.eup %479  ;;  %v384_v2 = vsel %vm382_vm9, 1.0, %v499_v5  ;;  %v148_v5 = vmul.f32 1.442695, %v598_v32 }
 0x203   :  { %v335_v0 = vsel %vm333_vm6, %v480_v59, 0.0  ;;  %v388_v3 = vsel %vm135_vm5, %v384_v2, 0.0  ;;  %v372_v13 = vsel %vm135_vm5, %v368_v9, 0.0 }
 0x204   :  { %v343_v1 = vsel %vm135_vm5, %v335_v0, 0.0  ;;  %483 = vpow2.f32 %v148_v5 }
 0x205   :  { %485 = vpow2.f32 %v146_v14 }
 0x206   :  { %v482_v60 = vpop.eup %481  ;;  %487 = vpow2.f32 %v404_v17 }
 0x207   :  { %v336_v62 = vsel %vm334_vm8, %v482_v60, 0.0  ;;  %489 = vpow2.f32 %v402_v19 }
 0x208   :  { %v346_v63 = vsel %vm135_vm5, %v336_v62, 0.0 }
 0x209   :  { %347 = vadd.xlane.f32.xlu1 %v346_v63 }
 0x20d   :  { %344 = vadd.xlane.f32.xlu1 %v343_v1 }
 0x20e   :  { %v484_v18 = vpop.eup %483 }
 0x20f   :  { %v342_v21 = vmul.f32 %v484_v18, %v340_v20  ;;  %v486_v24 = vpop.eup %485 }
 0x210   :  { %v341_v25 = vmul.f32 %v486_v24, %v339_v27  ;;  %v488_v29 = vpop.eup %487 }
 0x211   :  { %389 = vadd.xlane.f32.xlu1 %v388_v3  ;;  %v407_v34 = vmul.f32 4.0, %v488_v29  ;;  %v490_v36 = vpop.eup %489 }
 0x212   :  { %v406_v40 = vmul.f32 4.0, %v490_v36 }
 0x213   :  { %v387_v11 = vpop.xlane.xlu0 %386 }
 0x214   :  { %v391_v12 = vadd.f32 %v387_v11, %v379_v10 }
 0x215   :  { %356 = vadd.xlane.f32.xlu1 %v355_v4 }
 0x216   :  { %393 = vst.msk [vmem:[#allocation6] sm:$0xff] %vm28_vm4, %v391_v12 }
 0x219   :  { %359 = vadd.xlane.f32.xlu1 %v358_v6 }
 0x21d   :  { %370 = vadd.xlane.f32.xlu1 %v369_v8  ;;  %v424_v48 = vld [vmem:[#allocation6] sm:$0xff] }
 0x21e   :  { %v426_v52 = vadd.f32 1e-12, %v424_v48 }
 0x221   :  { %373 = vadd.xlane.f32.xlu1 %v372_v13 }
 0x296   :  { %v348_v26 = vpop.xlane.xlu1 %347 }
 0x297   :  { %v350_v28 = vadd.f32 %v348_v26, %v342_v21 }
 0x299   :  { %352 = vst.msk [vmem:[#allocation3 + $0x8] sm:$0xff] %vm28_vm4, %v350_v28 }
 0x29a   :  { %v345_v31 = vpop.xlane.xlu1 %344 }
 0x29b   :  { %v349_v32 = vadd.f32 %v345_v31, %v341_v25 }
 0x29d   :  { %351 = vst.msk [vmem:[#allocation3] sm:$0xff] %vm28_vm4, %v349_v32 }
 0x29e   :  { %v390_v22 = vpop.xlane.xlu1 %389 }
 0x29f   :  { %v392_v35 = vadd.f32 %v390_v22, %v380_v33 }
 0x2a0   :  { %v399_v37 = vld [vmem:[#allocation3 + $0x8] sm:$0xff] }
 0x2a1   :  { %v409_v38 = vsub.f32 %v399_v37, %v407_v34  ;;  %394 = vst.msk [vmem:[#allocation6 + $0x8] sm:$0xff] %vm28_vm4, %v392_v35 }
 0x2a2   :  { %v357_v39 = vpop.xlane.xlu1 %356 }
 0x2a3   :  { %v413_v41 = vadd.f32 1e-12, %v409_v38  ;;  %v361_v42 = vadd.f32 %v357_v39, %v583_v23  ;;  %v366_v23 = vld [vmem:[#allocation5 + $0x8] sm:$0xff] }
 0x2a4   :  { %v398_v43 = vld [vmem:[#allocation3] sm:$0xff] }
 0x2a5   :  { %v408_v44 = vsub.f32 %v398_v43, %v406_v40  ;;  %363 = vst.msk [vmem:[#allocation4] sm:$0xff] %vm28_vm4, %v361_v42  ;;  %491 = vlog2.f32 %v413_v41 }
 0x2a6   :  { %v360_v45 = vpop.xlane.xlu1 %359 }
 0x2a7   :  { %v412_v46 = vadd.f32 1e-12, %v408_v44  ;;  %v362_v47 = vadd.f32 %v360_v45, %v595_v30 }
 0x2a8   :  { %v425_v49 = vld [vmem:[#allocation6 + $0x8] sm:$0xff] }
 0x2a9   :  { %493 = vlog2.f32 %v412_v46  ;;  %364 = vst.msk [vmem:[#allocation4 + $0x8] sm:$0xff] %vm28_vm4, %v362_v47  ;;  %v427_v54 = vadd.f32 1e-12, %v425_v49 }
 0x2aa   :  { %v371_v51 = vpop.xlane.xlu1 %370  ;;  %495 = vrcp.f32 %v426_v52 }
 0x2ab   :  { %v375_v53 = vadd.f32 %v371_v51, %v365_v50  ;;  %497 = vrcp.f32 %v427_v54 }
 0x2ac   :  { %v418_v61 = vld [vmem:[#allocation4] sm:$0xff] }
 0x2ad   :  { %377 = vst.msk [vmem:[#allocation5] sm:$0xff] %vm28_vm4, %v375_v53 }
 0x2ae   :  { %v374_v55 = vpop.xlane.xlu1 %373 }
 0x2af   :  { %v376_v56 = vadd.f32 %v374_v55, %v366_v23  ;;  %v492_v57 = vpop.eup %491 }
 0x2b0   :  { %v417_v58 = vmul.f32 0.6931472, %v492_v57  ;;  %v419_v59 = vld [vmem:[#allocation4 + $0x8] sm:$0xff] }
 0x2b1   :  { %378 = vst.msk [vmem:[#allocation5 + $0x8] sm:$0xff] %vm28_vm4, %v376_v56 }
 0x2b2   :  { %v421_v0 = vmul.f32 %v419_v59, %v417_v58 }
 0x2b3   :  { %v494_v30 = vpop.eup %493 }
 0x2b4   :  { %v415_v60 = vmul.f32 0.6931472, %v494_v30  ;;  %v410_v63 = vld [vmem:[#allocation5] sm:$0xff]  ;;  %v496_v3 = vpop.eup %495 }
 0x2b5   :  { %v498_v6 = vpop.eup %497 }
 0x2b6   :  { %v420_v62 = vmul.f32 %v418_v61, %v415_v60 }
 0x2b8   :  { %v422_v1 = vsub.f32 %v410_v63, %v420_v62  ;;  %v411_v2 = vld [vmem:[#allocation5 + $0x8] sm:$0xff] }
 0x2b9   :  { %v423_v4 = vsub.f32 %v411_v2, %v421_v0 }
 0x2ba   :  { %v429_v7 = vmul.f32 %v496_v3, %v422_v1 }
 0x2bb   :  { %v431_v8 = vmul.f32 %v498_v6, %v423_v4 }
 0x2bc   :  { %432 = vst.msk [vmem:[%s653_s6] sm:$0xff] %vm28_vm4, %v429_v7 }
 0x2bd   :  { %433 = vst.msk [vmem:[%s653_s6 + $0x8] sm:$0xff] %vm28_vm4, %v431_v8 }

</bundles_post_ra>
